<compile_context>
chip_gen: v6e
topology: v6e:2x2x1
jax: 0.10.0
libtpu: 0.0.40
codegen_flags: <defaults>
</compile_context>

<pallas_src>
import functools

import jax
import jax.numpy as jnp
from jax import lax
from jax.experimental import pallas as pl
from jax.experimental.pallas import tpu as pltpu


# ----------------------------------------------------------------------------
# Kernel A: fused 1x1 expand conv (BN1 scale folded into weights) + shift
# + ReLU6, over flattened spatial rows (channels-last).
# x: (TN, Cin), w: (Cin, Chid), b: (1, Chid) -> o: (TN, Chid)
# ----------------------------------------------------------------------------
def _pw_bn_relu6_kernel(x_ref, w_ref, b_ref, o_ref):
    y = jnp.dot(x_ref[...], w_ref[...], preferred_element_type=jnp.float32)
    o_ref[...] = jnp.clip(y + b_ref[...], 0.0, 6.0).astype(o_ref.dtype)


def pointwise_conv_bn_relu6(x_rows, w, b, *, tile_rows=512):
    n, cin = x_rows.shape
    cout = w.shape[1]
    n_tiles = pl.cdiv(n, tile_rows)
    n_pad = n_tiles * tile_rows
    if n_pad != n:
        x_rows = jnp.pad(x_rows, ((0, n_pad - n), (0, 0)))
    out = pl.pallas_call(
        _pw_bn_relu6_kernel,
        out_shape=jax.ShapeDtypeStruct((n_pad, cout), jnp.float32),
        grid_spec=pltpu.PrefetchScalarGridSpec(
            num_scalar_prefetch=0,
            grid=(n_tiles,),
            in_specs=[
                pl.BlockSpec((tile_rows, cin), lambda i: (i, 0)),
                pl.BlockSpec((cin, cout), lambda i: (0, 0)),
                pl.BlockSpec((1, cout), lambda i: (0, 0)),
            ],
            out_specs=pl.BlockSpec((tile_rows, cout), lambda i: (i, 0)),
        ),
        compiler_params=pltpu.CompilerParams(dimension_semantics=("parallel",)),
    )(x_rows, w, b.reshape(1, cout))
    return out[:n] if n_pad != n else out


# ----------------------------------------------------------------------------
# Kernel B: fused dilated 3x3 depthwise conv (BN2 scale folded into the 9 tap
# weights) + shift + ReLU6 + 1x1 projection conv (BN3 scale folded) + shift
# (+ ReLU6) (+ residual).  One batch element per grid step; the 9 shifted
# neighborhood views are built in VMEM with static slices.
# h1p: (1, Hp, Wp, Chid)  dw: (9, Chid)  b2: (1, Chid)
# w3:  (Chid, Cout)       b3: (1, Cout)  [res: (1, Ho, Wo, Cout)]
# ----------------------------------------------------------------------------
def _dw_pw_block_kernel(*refs, H_out, W_out, stride, dilation, with_relu,
                        use_res):
    if use_res:
        h_ref, dw_ref, b2_ref, w3_ref, b3_ref, res_ref, o_ref = refs
    else:
        h_ref, dw_ref, b2_ref, w3_ref, b3_ref, o_ref = refs
        res_ref = None

    h = h_ref[0]                      # (Hp, Wp, Chid), zero-padded by dilation
    dw = dw_ref[...]                  # (9, Chid), BN2 scale already folded in
    hidden = dw.shape[1]
    oup = w3_ref.shape[1]

    # Depthwise dilated 3x3: sum of 9 statically-shifted views, each weighted
    # by a per-channel row (broadcast over the spatial tile).  No 9x HBM blow-up.
    acc = None
    for i in range(3):
        for j in range(3):
            r0 = i * dilation
            c0 = j * dilation
            tap = h[r0:r0 + (H_out - 1) * stride + 1:stride,
                    c0:c0 + (W_out - 1) * stride + 1:stride, :]
            term = tap * dw[i * 3 + j:i * 3 + j + 1, :]
            acc = term if acc is None else acc + term
    acc = jnp.clip(acc + b2_ref[...], 0.0, 6.0)          # BN2 shift + ReLU6

    # 1x1 projection conv (BN3 scale folded into w3) + shift.
    y = jnp.dot(acc.reshape(H_out * W_out, hidden), w3_ref[...],
                preferred_element_type=jnp.float32)
    y = y + b3_ref[...]
    if with_relu:
        y = jnp.clip(y, 0.0, 6.0)
    y = y.reshape(H_out, W_out, oup)
    if use_res:
        y = y + res_ref[0]
    o_ref[0] = y.astype(o_ref.dtype)


def dw_pw_block(h1p, dwf, b2, w3f, b3, res, *, H_out, W_out, stride, dilation,
                with_relu):
    B, Hp, Wp, hidden = h1p.shape
    oup = w3f.shape[1]
    use_res = res is not None
    kern = functools.partial(
        _dw_pw_block_kernel, H_out=H_out, W_out=W_out, stride=stride,
        dilation=dilation, with_relu=with_relu, use_res=use_res)

    in_specs = [
        pl.BlockSpec((1, Hp, Wp, hidden), lambda i: (i, 0, 0, 0)),
        pl.BlockSpec((9, hidden), lambda i: (0, 0)),
        pl.BlockSpec((1, hidden), lambda i: (0, 0)),
        pl.BlockSpec((hidden, oup), lambda i: (0, 0)),
        pl.BlockSpec((1, oup), lambda i: (0, 0)),
    ]
    args = [h1p, dwf, b2.reshape(1, hidden), w3f, b3.reshape(1, oup)]
    if use_res:
        in_specs.append(
            pl.BlockSpec((1, H_out, W_out, oup), lambda i: (i, 0, 0, 0)))
        args.append(res)

    return pl.pallas_call(
        kern,
        out_shape=jax.ShapeDtypeStruct((B, H_out, W_out, oup), jnp.float32),
        grid_spec=pltpu.PrefetchScalarGridSpec(
            num_scalar_prefetch=0,
            grid=(B,),
            in_specs=in_specs,
            out_specs=pl.BlockSpec((1, H_out, W_out, oup),
                                   lambda i: (i, 0, 0, 0)),
        ),
        compiler_params=pltpu.CompilerParams(dimension_semantics=("parallel",)),
    )(*args)


# ----------------------------------------------------------------------------
# Parameter folding + full forward (public API matches PyTorch: NCHW in/out).
# ----------------------------------------------------------------------------
def _fold_bn(bn, eps=1e-5):
    gamma, beta, mean, var = bn
    s = gamma / jnp.sqrt(var + eps)
    t = beta - mean * s
    return s, t


def mobilev1_aspp_forward(x, params, *, stride, dilation, with_relu=False):
    assert stride in (1, 2)
    B, Cin, H, W = x.shape
    hidden = params["w1"].shape[0]
    oup = params["w3"].shape[0]
    use_res = (stride == 1 and Cin == oup)
    d = dilation

    # Fold eval-mode BatchNorms into the conv weights / biases (trace-time).
    s1, t1 = _fold_bn(params["bn1"])
    s2, t2 = _fold_bn(params["bn2"])
    s3, t3 = _fold_bn(params["bn3"])
    w1f = params["w1"].T * s1[None, :]                       # (Cin, hidden)
    dwf = params["dw"].reshape(hidden, 9).T * s2[None, :]    # (9, hidden)
    w3f = params["w3"].T * s3[None, :]                       # (hidden, oup)

    # Channels-last rows for the 1x1 expand conv (channels on lanes).
    x_nhwc = x.transpose(0, 2, 3, 1)                         # (B, H, W, Cin)
    rows = x_nhwc.reshape(B * H * W, Cin)
    h1 = pointwise_conv_bn_relu6(rows, w1f, t1)              # (BHW, hidden)
    h1 = h1.reshape(B, H, W, hidden)

    # Zero-pad the hidden feature spatially (depthwise conv padding=dilation).
    h1p = jnp.pad(h1, ((0, 0), (d, d), (d, d), (0, 0)))

    H_out = (H - 1) // stride + 1
    W_out = (W - 1) // stride + 1
    res = x_nhwc if use_res else None
    out_nhwc = dw_pw_block(h1p, dwf, t2, w3f, t3, res,
                           H_out=H_out, W_out=W_out, stride=stride,
                           dilation=dilation, with_relu=with_relu)
    return out_nhwc.transpose(0, 3, 1, 2)                    # NCHW


# ----------------------------------------------------------------------------
# Pure-JAX reference (unfolded BN math, lax.conv for the depthwise conv).
# ----------------------------------------------------------------------------
def reference_forward(x, params, *, stride, dilation, with_relu=False):
    hp = jax.lax.Precision.HIGHEST

    def bn(z, p):
        g, b, m, v = p
        g, b, m, v = (a[None, :, None, None] for a in (g, b, m, v))
        return (z - m) / jnp.sqrt(v + 1e-5) * g + b

    def relu6(z):
        return jnp.clip(z, 0.0, 6.0)

    B, Cin, H, W = x.shape
    hidden = params["w1"].shape[0]
    oup = params["w3"].shape[0]
    d = dilation

    y = jnp.einsum("bchw,oc->bohw", x, params["w1"], precision=hp)
    y = relu6(bn(y, params["bn1"]))
    z = lax.conv_general_dilated(
        y, params["dw"].reshape(hidden, 1, 3, 3),
        window_strides=(stride, stride), padding=[(d, d), (d, d)],
        rhs_dilation=(d, d), feature_group_count=hidden,
        dimension_numbers=("NCHW", "OIHW", "NCHW"), precision=hp)
    z = relu6(bn(z, params["bn2"]))
    out = jnp.einsum("bchw,oc->bohw", z, params["w3"], precision=hp)
    out = bn(out, params["bn3"])
    if with_relu:
        out = relu6(out)
    if stride == 1 and Cin == oup:
        out = x + out
    return out


# ----------------------------------------------------------------------------
if __name__ == "__main__":
    def make_params(key, inp, hidden, oup):
        ks = jax.random.split(key, 6)

        def bn_params(k, c):
            k1, k2, k3, k4 = jax.random.split(k, 4)
            gamma = 0.5 + jax.random.uniform(k1, (c,), jnp.float32)
            beta = 0.1 * jax.random.normal(k2, (c,), jnp.float32)
            mean = 0.1 * jax.random.normal(k3, (c,), jnp.float32)
            var = 0.5 + jax.random.uniform(k4, (c,), jnp.float32)
            return (gamma, beta, mean, var)

        return {
            "w1": (2.0 / (inp + hidden)) ** 0.5
                  * jax.random.normal(ks[0], (hidden, inp), jnp.float32),
            "dw": 0.3 * jax.random.normal(ks[1], (hidden, 3, 3), jnp.float32),
            "w3": (2.0 / (hidden + oup)) ** 0.5
                  * jax.random.normal(ks[2], (oup, hidden), jnp.float32),
            "bn1": bn_params(ks[3], hidden),
            "bn2": bn_params(ks[4], hidden),
            "bn3": bn_params(ks[5], oup),
        }

    configs = [
        # residual path: stride=1, inp==oup, dilated depthwise
        dict(B=2, inp=32, oup=32, stride=1, dilation=2, expand_ratio=2,
             with_relu=False, H=16, W=16),
        # no residual, with final ReLU6
        dict(B=2, inp=16, oup=32, stride=1, dilation=1, expand_ratio=2,
             with_relu=True, H=16, W=16),
    ]

    root = jax.random.PRNGKey(0)
    keys = jax.random.split(root, 2 * len(configs))
    for ci, cfg in enumerate(configs):
        hidden = cfg["inp"] * cfg["expand_ratio"]
        params = make_params(keys[2 * ci], cfg["inp"], hidden, cfg["oup"])
        x = jax.random.normal(
            keys[2 * ci + 1], (cfg["B"], cfg["inp"], cfg["H"], cfg["W"]),
            jnp.float32)

        out = mobilev1_aspp_forward(
            x, params, stride=cfg["stride"], dilation=cfg["dilation"],
            with_relu=cfg["with_relu"])
        out = jax.block_until_ready(out)

        ref = reference_forward(
            x, params, stride=cfg["stride"], dilation=cfg["dilation"],
            with_relu=cfg["with_relu"])
        ref = jax.block_until_ready(ref)

        H_out = (cfg["H"] - 1) // cfg["stride"] + 1
        W_out = (cfg["W"] - 1) // cfg["stride"] + 1
        assert out.shape == (cfg["B"], cfg["oup"], H_out, W_out), out.shape

        err = float(jnp.max(jnp.abs(out - ref)))
        # Tolerance covers default-precision MXU matmuls in the kernels vs the
        # HIGHEST-precision reference plus BN-folding rounding differences.
        assert err < 2.5e-2, f"config {ci}: max abs err = {err}"

    print("KERNEL_OK")
</pallas_src>

<mosaic_0001>
module attributes {stable_mosaic.version = 11 : i64} {
  func.func @_pw_bn_relu6_kernel(%arg0: i32, %arg1: memref<512x32xf32, #tpu.memory_space<vmem>>, %arg2: memref<32x64xf32, #tpu.memory_space<vmem>>, %arg3: memref<1x64xf32, #tpu.memory_space<vmem>>, %arg4: memref<512x64xf32, #tpu.memory_space<vmem>>) attributes {dimension_semantics = [#tpu.dimension_semantics<parallel>], iteration_bounds = array<i64: 1>, scalar_prefetch = 0 : i64, scratch_operands = 0 : i64, tpu.core_type = #tpu.core_type<tc>, window_params = [{transform_indices = @transform_0, window_bounds = array<i64: 512, 32>}, {pipeline_mode = #tpu.pipeline_mode<synchronous>, transform_indices = @transform_1, window_bounds = array<i64: 32, 64>}, {pipeline_mode = #tpu.pipeline_mode<synchronous>, transform_indices = @transform_2, window_bounds = array<i64: 1, 64>}, {transform_indices = @transform_3, window_bounds = array<i64: 512, 64>}]} {
    %c0 = arith.constant 0 : index
    %c0_0 = arith.constant 0 : index
    %0 = vector.load %arg1[%c0, %c0_0] : memref<512x32xf32, #tpu.memory_space<vmem>>, vector<512x32xf32>
    %c0_1 = arith.constant 0 : index
    %c0_2 = arith.constant 0 : index
    %1 = vector.load %arg2[%c0_1, %c0_2] : memref<32x64xf32, #tpu.memory_space<vmem>>, vector<32x64xf32>
    %cst = arith.constant dense<0.000000e+00> : vector<512x64xf32>
    %2 = tpu.matmul %0, %1, %cst {dimension_numbers = #tpu.dot_dimension_numbers<[1], [0], [0], [1], [0, 0, 1, 1], [], []>} : vector<512x32xf32>, vector<32x64xf32>, vector<512x64xf32> -> vector<512x64xf32>
    %c0_3 = arith.constant 0 : index
    %c0_4 = arith.constant 0 : index
    %3 = vector.load %arg3[%c0_3, %c0_4] : memref<1x64xf32, #tpu.memory_space<vmem>>, vector<1x64xf32>
    %4 = vector.broadcast %3 : vector<1x64xf32> to vector<512x64xf32>
    %5 = arith.addf %2, %4 : vector<512x64xf32>
    %cst_5 = arith.constant 0.000000e+00 : f32
    %cst_6 = arith.constant 6.000000e+00 : f32
    %6 = vector.broadcast %cst_5 : f32 to vector<512x64xf32>
    %7 = arith.maximumf %6, %5 : vector<512x64xf32>
    %8 = vector.broadcast %cst_6 : f32 to vector<512x64xf32>
    %9 = arith.minimumf %8, %7 : vector<512x64xf32>
    %c0_7 = arith.constant 0 : index
    %c0_8 = arith.constant 0 : index
    %10 = vector.load %arg4[%c0_7, %c0_8] : memref<512x64xf32, #tpu.memory_space<vmem>>, vector<512x64xf32>
    tpu.vector_store %arg4[%c0_7, %c0_8], %9 {strides = array<i32>} : memref<512x64xf32, #tpu.memory_space<vmem>>, vector<512x64xf32>,
    return
  }
  func.func @transform_0(%arg0: i32) -> (i32, i32) {
    %c0_i32 = arith.constant 0 : i32
    %c0_i32_0 = arith.constant 0 : i32
    return %arg0, %c0_i32 : i32, i32
  }
  func.func @transform_1(%arg0: i32) -> (i32, i32) {
    %c0_i32 = arith.constant 0 : i32
    %c0_i32_0 = arith.constant 0 : i32
    %c0_i32_1 = arith.constant 0 : i32
    return %c0_i32, %c0_i32_0 : i32, i32
  }
  func.func @transform_2(%arg0: i32) -> (i32, i32) {
    %c0_i32 = arith.constant 0 : i32
    %c0_i32_0 = arith.constant 0 : i32
    %c0_i32_1 = arith.constant 0 : i32
    return %c0_i32, %c0_i32_0 : i32, i32
  }
  func.func @transform_3(%arg0: i32) -> (i32, i32) {
    %c0_i32 = arith.constant 0 : i32
    %c0_i32_0 = arith.constant 0 : i32
    return %arg0, %c0_i32 : i32, i32
  }
}

</mosaic_0001>

<bundles_post_ra>
// kernel: tpu_custom_call.1
= control target key start
LH: loop header
LB: loop body
LE: loop exit
PB: predicated region body
PF: predicated region fallthrough
CT: control target
= control target key end

     0   :  { %vm89_vm0 = vcmask 261120   ;;  %vm795_vm1 = vcmask 523264   ;;  %s1722_s1 = inlined_call_operand.vmem [shape: f32[32,64], index: 1, kind: input, shape index: {}]   ;;  %s1723_s0 = inlined_call_operand.vmem [shape: f32[512,32], index: 0, kind: input, shape index: {}]   ;;  %s1724_s2 = inlined_call_operand.vmem [shape: f32[1,64], index: 2, kind: input, shape index: {}]   ;;  %s1725_s3 = inlined_call_operand.vmem [shape: f32[512,64], index: 3, kind: output, shape index: {}]  }
   0x1   :  { %v81_v0 = vld [vmem:[%s1722_s1 + $0x18] sm:$0xff]  ;;  %v80_v1 = vld [vmem:[%s1722_s1 + $0x10] sm:$0xff]  ;;  %v79_v2 = vld [vmem:[%s1722_s1 + $0x8] sm:$0xff] }
   0x2   :  { %997 = vmatprep.subr.mxu0 %v81_v0  ;;  %1101 = vmatprep.subr.mxu1 %v81_v0  ;;  %v78_v3 = vld [vmem:[%s1722_s1] sm:$0xff]  ;;  %v15_v6 = vld [vmem:[%s1723_s0 + $0x8] sm:$0xff]  ;;  %v16_v8 = vld [vmem:[%s1723_s0 + $0x10] sm:$0xff] }
   0x3   :  { %998 = vmatpush3.msra.mxu0 %v81_v0  ;;  %1105 = vmatpush3.msra.mxu1 %v81_v0  ;;  %v14_v4 = vld [vmem:[%s1723_s0] sm:$0xff]  ;;  %v47_v7 = vld [vmem:[%s1723_s0 + $0x108] sm:$0xff]  ;;  %v48_v9 = vld [vmem:[%s1723_s0 + $0x110] sm:$0xff] }
   0x4   :  { %999 = vmatprep.subr.mxu0 %v80_v1  ;;  %1102 = vmatprep.subr.mxu1 %v80_v1  ;;  %v46_v5 = vld [vmem:[%s1723_s0 + $0x100] sm:$0xff]  ;;  %v17_v10 = vld [vmem:[%s1723_s0 + $0x18] sm:$0xff]  ;;  %v19_v14 = vld [vmem:[%s1723_s0 + $0x28] sm:$0xff] }
   0x5   :  { %1000 = vmatpush3.msra.mxu0 %v80_v1  ;;  %1106 = vmatpush3.msra.mxu1 %v80_v1  ;;  %v49_v11 = vld [vmem:[%s1723_s0 + $0x118] sm:$0xff]  ;;  %v18_v12 = vld [vmem:[%s1723_s0 + $0x20] sm:$0xff]  ;;  %v51_v15 = vld [vmem:[%s1723_s0 + $0x128] sm:$0xff] }
   0x6   :  { %1001 = vmatprep.subr.mxu0 %v79_v2  ;;  %1103 = vmatprep.subr.mxu1 %v79_v2  ;;  %v50_v13 = vld [vmem:[%s1723_s0 + $0x120] sm:$0xff]  ;;  %v20_v16 = vld [vmem:[%s1723_s0 + $0x30] sm:$0xff]  ;;  %v21_v18 = vld [vmem:[%s1723_s0 + $0x38] sm:$0xff] }
   0x7   :  { %1002 = vmatpush3.msra.mxu0 %v79_v2  ;;  %1107 = vmatpush3.msra.mxu1 %v79_v2  ;;  %v52_v17 = vld [vmem:[%s1723_s0 + $0x130] sm:$0xff]  ;;  %v53_v19 = vld [vmem:[%s1723_s0 + $0x138] sm:$0xff]  ;;  %v22_v20 = vld [vmem:[%s1723_s0 + $0x40] sm:$0xff] }
   0x8   :  { %1003 = vmatprep.subr.mxu0 %v78_v3  ;;  %1104 = vmatprep.subr.mxu1 %v78_v3  ;;  %v54_v21 = vld [vmem:[%s1723_s0 + $0x140] sm:$0xff]  ;;  %v23_v22 = vld [vmem:[%s1723_s0 + $0x48] sm:$0xff]  ;;  %v24_v24 = vld [vmem:[%s1723_s0 + $0x50] sm:$0xff] }
   0x9   :  { %1004 = vmatpush3.msra.mxu0 %v78_v3  ;;  %1108 = vmatpush3.msra.mxu1 %v78_v3  ;;  %v55_v23 = vld [vmem:[%s1723_s0 + $0x148] sm:$0xff]  ;;  %v56_v25 = vld [vmem:[%s1723_s0 + $0x150] sm:$0xff]  ;;  %v25_v26 = vld [vmem:[%s1723_s0 + $0x58] sm:$0xff] }
   0xa   :  { %1005 = vmatprep.mubr.msk.f32.mxu0 %vm89_vm0, %v14_v4  ;;  %1053 = vmatprep.mubr.msk.f32.mxu1 %vm89_vm0, %v46_v5  ;;  %v57_v27 = vld [vmem:[%s1723_s0 + $0x158] sm:$0xff]  ;;  %v26_v28 = vld [vmem:[%s1723_s0 + $0x60] sm:$0xff]  ;;  %v27_v30 = vld [vmem:[%s1723_s0 + $0x68] sm:$0xff] }
   0xb   :  { %1006 = vmatmul.mubr.msk.f32.vlgmr.msra.gmra.mxu0 %vm89_vm0, %v15_v6  ;;  %1054 = vmatmul.mubr.msk.f32.vlgmr.msra.gmra.mxu1 %vm89_vm0, %v47_v7  ;;  %v58_v29 = vld [vmem:[%s1723_s0 + $0x160] sm:$0xff]  ;;  %v59_v31 = vld [vmem:[%s1723_s0 + $0x168] sm:$0xff]  ;;  %v28_v32 = vld [vmem:[%s1723_s0 + $0x70] sm:$0xff] }
   0xc   :  { %1008 = vmatprep.mubr.msk.f32.mxu0 %vm89_vm0, %v16_v8  ;;  %1056 = vmatprep.mubr.msk.f32.mxu1 %vm89_vm0, %v48_v9  ;;  %v60_v33 = vld [vmem:[%s1723_s0 + $0x170] sm:$0xff]  ;;  %v29_v34 = vld [vmem:[%s1723_s0 + $0x78] sm:$0xff]  ;;  %v30_v36 = vld [vmem:[%s1723_s0 + $0x80] sm:$0xff] }
   0xd   :  { %v61_v35 = vld [vmem:[%s1723_s0 + $0x178] sm:$0xff]  ;;  %v62_v37 = vld [vmem:[%s1723_s0 + $0x180] sm:$0xff]  ;;  %v31_v38 = vld [vmem:[%s1723_s0 + $0x88] sm:$0xff] }
   0xe   :  { %v63_v39 = vld [vmem:[%s1723_s0 + $0x188] sm:$0xff]  ;;  %v32_v40 = vld [vmem:[%s1723_s0 + $0x90] sm:$0xff]  ;;  %v33_v42 = vld [vmem:[%s1723_s0 + $0x98] sm:$0xff] }
   0xf   :  { %1009 = vmatmul.mubr.msk.f32.gmra.mxu0 %vm89_vm0, %v17_v10  ;;  %1057 = vmatmul.mubr.msk.f32.gmra.mxu1 %vm89_vm0, %v49_v11  ;;  %v64_v41 = vld [vmem:[%s1723_s0 + $0x190] sm:$0xff]  ;;  %v65_v43 = vld [vmem:[%s1723_s0 + $0x198] sm:$0xff]  ;;  %v34_v44 = vld [vmem:[%s1723_s0 + $0xa0] sm:$0xff] }
  0x10   :  { %1011 = vmatprep.mubr.msk.f32.mxu0 %vm89_vm0, %v18_v12  ;;  %1059 = vmatprep.mubr.msk.f32.mxu1 %vm89_vm0, %v50_v13  ;;  %v66_v45 = vld [vmem:[%s1723_s0 + $0x1a0] sm:$0xff]  ;;  %v35_v46 = vld [vmem:[%s1723_s0 + $0xa8] sm:$0xff]  ;;  %v36_v48 = vld [vmem:[%s1723_s0 + $0xb0] sm:$0xff] }
  0x11   :  { %v67_v47 = vld [vmem:[%s1723_s0 + $0x1a8] sm:$0xff]  ;;  %v68_v49 = vld [vmem:[%s1723_s0 + $0x1b0] sm:$0xff]  ;;  %v37_v50 = vld [vmem:[%s1723_s0 + $0xb8] sm:$0xff] }
  0x12   :  { %v69_v51 = vld [vmem:[%s1723_s0 + $0x1b8] sm:$0xff]  ;;  %v38_v52 = vld [vmem:[%s1723_s0 + $0xc0] sm:$0xff]  ;;  %v39_v54 = vld [vmem:[%s1723_s0 + $0xc8] sm:$0xff] }
  0x13   :  { %1012 = vmatmul.mubr.msk.f32.gmra.mxu0 %vm89_vm0, %v19_v14  ;;  %1060 = vmatmul.mubr.msk.f32.gmra.mxu1 %vm89_vm0, %v51_v15  ;;  %v70_v53 = vld [vmem:[%s1723_s0 + $0x1c0] sm:$0xff]  ;;  %v71_v55 = vld [vmem:[%s1723_s0 + $0x1c8] sm:$0xff]  ;;  %v40_v56 = vld [vmem:[%s1723_s0 + $0xd0] sm:$0xff] }
  0x14   :  { %1014 = vmatprep.mubr.msk.f32.mxu0 %vm89_vm0, %v20_v16  ;;  %1062 = vmatprep.mubr.msk.f32.mxu1 %vm89_vm0, %v52_v17  ;;  %v72_v57 = vld [vmem:[%s1723_s0 + $0x1d0] sm:$0xff]  ;;  %v41_v58 = vld [vmem:[%s1723_s0 + $0xd8] sm:$0xff]  ;;  %v42_v60 = vld [vmem:[%s1723_s0 + $0xe0] sm:$0xff] }
  0x15   :  { %v73_v59 = vld [vmem:[%s1723_s0 + $0x1d8] sm:$0xff]  ;;  %v74_v61 = vld [vmem:[%s1723_s0 + $0x1e0] sm:$0xff]  ;;  %v43_v62 = vld [vmem:[%s1723_s0 + $0xe8] sm:$0xff] }
  0x16   :  { %v75_v63 = vld [vmem:[%s1723_s0 + $0x1e8] sm:$0xff]  ;;  %v44_v0 = vld [vmem:[%s1723_s0 + $0xf0] sm:$0xff]  ;;  %v45_v2 = vld [vmem:[%s1723_s0 + $0xf8] sm:$0xff] }
  0x17   :  { %1015 = vmatmul.mubr.msk.f32.gmra.mxu0 %vm89_vm0, %v21_v18  ;;  %1063 = vmatmul.mubr.msk.f32.gmra.mxu1 %vm89_vm0, %v53_v19  ;;  %v76_v1 = vld [vmem:[%s1723_s0 + $0x1f0] sm:$0xff]  ;;  %v77_v3 = vld [vmem:[%s1723_s0 + $0x1f8] sm:$0xff]  ;;  %v1400_v4 = vld [vmem:[%s1724_s2] ss:$0 sm:$0xff] }
  0x18   :  { %1017 = vmatprep.mubr.msk.f32.mxu0 %vm89_vm0, %v22_v20  ;;  %1065 = vmatprep.mubr.msk.f32.mxu1 %vm89_vm0, %v54_v21 }
  0x1b   :  { %1018 = vmatmul.mubr.msk.f32.gmra.mxu0 %vm89_vm0, %v23_v22  ;;  %1066 = vmatmul.mubr.msk.f32.gmra.mxu1 %vm89_vm0, %v55_v23 }
  0x1c   :  { %1020 = vmatprep.mubr.msk.f32.mxu0 %vm89_vm0, %v24_v24  ;;  %1068 = vmatprep.mubr.msk.f32.mxu1 %vm89_vm0, %v56_v25 }
  0x1f   :  { %1021 = vmatmul.mubr.msk.f32.gmra.mxu0 %vm89_vm0, %v25_v26  ;;  %1069 = vmatmul.mubr.msk.f32.gmra.mxu1 %vm89_vm0, %v57_v27 }
  0x20   :  { %1023 = vmatprep.mubr.msk.f32.mxu0 %vm89_vm0, %v26_v28  ;;  %1071 = vmatprep.mubr.msk.f32.mxu1 %vm89_vm0, %v58_v29 }
  0x23   :  { %1024 = vmatmul.mubr.msk.f32.gmra.mxu0 %vm89_vm0, %v27_v30  ;;  %1072 = vmatmul.mubr.msk.f32.gmra.mxu1 %vm89_vm0, %v59_v31 }
  0x24   :  { %1026 = vmatprep.mubr.msk.f32.mxu0 %vm89_vm0, %v28_v32  ;;  %1074 = vmatprep.mubr.msk.f32.mxu1 %vm89_vm0, %v60_v33 }
  0x27   :  { %1027 = vmatmul.mubr.msk.f32.gmra.mxu0 %vm89_vm0, %v29_v34  ;;  %1075 = vmatmul.mubr.msk.f32.gmra.mxu1 %vm89_vm0, %v61_v35 }
  0x28   :  { %1029 = vmatprep.mubr.msk.f32.mxu0 %vm89_vm0, %v30_v36  ;;  %1077 = vmatprep.mubr.msk.f32.mxu1 %vm89_vm0, %v62_v37 }
  0x2b   :  { %1030 = vmatmul.mubr.msk.f32.gmra.mxu0 %vm89_vm0, %v31_v38  ;;  %1078 = vmatmul.mubr.msk.f32.gmra.mxu1 %vm89_vm0, %v63_v39 }
  0x2c   :  { %1032 = vmatprep.mubr.msk.f32.mxu0 %vm89_vm0, %v32_v40  ;;  %1080 = vmatprep.mubr.msk.f32.mxu1 %vm89_vm0, %v64_v41 }
  0x2f   :  { %1033 = vmatmul.mubr.msk.f32.gmra.mxu0 %vm89_vm0, %v33_v42  ;;  %1081 = vmatmul.mubr.msk.f32.gmra.mxu1 %vm89_vm0, %v65_v43 }
  0x30   :  { %1035 = vmatprep.mubr.msk.f32.mxu0 %vm89_vm0, %v34_v44  ;;  %1083 = vmatprep.mubr.msk.f32.mxu1 %vm89_vm0, %v66_v45 }
  0x33   :  { %1036 = vmatmul.mubr.msk.f32.gmra.mxu0 %vm89_vm0, %v35_v46  ;;  %1084 = vmatmul.mubr.msk.f32.gmra.mxu1 %vm89_vm0, %v67_v47 }
  0x34   :  { %1038 = vmatprep.mubr.msk.f32.mxu0 %vm89_vm0, %v36_v48  ;;  %1086 = vmatprep.mubr.msk.f32.mxu1 %vm89_vm0, %v68_v49 }
  0x37   :  { %1039 = vmatmul.mubr.msk.f32.gmra.mxu0 %vm89_vm0, %v37_v50  ;;  %1087 = vmatmul.mubr.msk.f32.gmra.mxu1 %vm89_vm0, %v69_v51 }
  0x38   :  { %1041 = vmatprep.mubr.msk.f32.mxu0 %vm89_vm0, %v38_v52  ;;  %1089 = vmatprep.mubr.msk.f32.mxu1 %vm89_vm0, %v70_v53 }
  0x3b   :  { %1042 = vmatmul.mubr.msk.f32.gmra.mxu0 %vm89_vm0, %v39_v54  ;;  %1090 = vmatmul.mubr.msk.f32.gmra.mxu1 %vm89_vm0, %v71_v55 }
  0x3c   :  { %1044 = vmatprep.mubr.msk.f32.mxu0 %vm89_vm0, %v40_v56  ;;  %1092 = vmatprep.mubr.msk.f32.mxu1 %vm89_vm0, %v72_v57 }
  0x3f   :  { %1045 = vmatmul.mubr.msk.f32.gmra.mxu0 %vm89_vm0, %v41_v58  ;;  %1093 = vmatmul.mubr.msk.f32.gmra.mxu1 %vm89_vm0, %v73_v59 }
  0x40   :  { %1047 = vmatprep.mubr.msk.f32.mxu0 %vm89_vm0, %v42_v60  ;;  %1095 = vmatprep.mubr.msk.f32.mxu1 %vm89_vm0, %v74_v61 }
  0x43   :  { %1048 = vmatmul.mubr.msk.f32.gmra.mxu0 %vm89_vm0, %v43_v62  ;;  %1096 = vmatmul.mubr.msk.f32.gmra.mxu1 %vm89_vm0, %v75_v63 }
  0x44   :  { %1050 = vmatprep.mubr.msk.f32.mxu0 %vm89_vm0, %v44_v0  ;;  %1098 = vmatprep.mubr.msk.f32.mxu1 %vm89_vm0, %v76_v1 }
  0x47   :  { %1051 = vmatmul.mubr.msk.f32.gmra.mxu0 %vm89_vm0, %v45_v2  ;;  %1099 = vmatmul.mubr.msk.f32.gmra.mxu1 %vm89_vm0, %v77_v3 }
  0xcb   :  { %v1007_v5 = vpop.f32.mrf.mxu0  ;;  %v1055_v6 = vpop.f32.mrf.mxu1 }
  0xcc   :  { %v354_v7 = vadd.f32 %v1007_v5, %v1400_v4  ;;  %v514_v8 = vadd.f32 %v1055_v6, %v1400_v4 }
  0xcd   :  { %v348_v9 = vpop.f32.mrf.mxu0  ;;  %v508_v10 = vpop.f32.mrf.mxu1 }
  0xce   :  { %v668_v11 = vmax.f32 %v354_v7, 0.0  ;;  %v700_v12 = vmax.f32 %v514_v8, 0.0  ;;  %v349_v13 = vadd.f32 %v1400_v4, %v348_v9  ;;  %v509_v14 = vadd.f32 %v1400_v4, %v508_v10 }
  0xcf   :  { %v1010_v15 = vpop.f32.mrf.mxu0  ;;  %v1058_v16 = vpop.f32.mrf.mxu1 }
  0xd0   :  { %v732_v17 = vmin.f32 %v668_v11, 6.0  ;;  %v764_v18 = vmin.f32 %v700_v12, 6.0  ;;  %v667_v19 = vmax.f32 %v349_v13, 0.0  ;;  %v699_v20 = vmax.f32 %v509_v14, 0.0 }
  0xd1   :  { %v364_v21 = vadd.f32 %v1010_v15, %v1400_v4  ;;  %v524_v22 = vadd.f32 %v1058_v16, %v1400_v4  ;;  %v358_v23 = vpop.f32.mrf.mxu0  ;;  %v518_v24 = vpop.f32.mrf.mxu1 }
  0xd2   :  { %797 = vst.msk [vmem:[%s1725_s3 + $0x8] sm:$0xff] %vm795_vm1, %v732_v17  ;;  %829 = vst.msk [vmem:[%s1725_s3 + $0x108] sm:$0xff] %vm795_vm1, %v764_v18  ;;  %v731_v25 = vmin.f32 %v667_v19, 6.0  ;;  %v763_v26 = vmin.f32 %v699_v20, 6.0  ;;  %v359_v27 = vadd.f32 %v1400_v4, %v358_v23  ;;  %v519_v28 = vadd.f32 %v1400_v4, %v518_v24 }
  0xd3   :  { %v670_v29 = vmax.f32 %v364_v21, 0.0  ;;  %v702_v30 = vmax.f32 %v524_v22, 0.0  ;;  %v1013_v31 = vpop.f32.mrf.mxu0  ;;  %v1061_v32 = vpop.f32.mrf.mxu1 }
  0xd4   :  { %796 = vst.msk [vmem:[%s1725_s3] sm:$0xff] %vm795_vm1, %v731_v25  ;;  %828 = vst.msk [vmem:[%s1725_s3 + $0x100] sm:$0xff] %vm795_vm1, %v763_v26  ;;  %v669_v33 = vmax.f32 %v359_v27, 0.0  ;;  %v701_v34 = vmax.f32 %v519_v28, 0.0  ;;  %v374_v35 = vadd.f32 %v1013_v31, %v1400_v4  ;;  %v534_v36 = vadd.f32 %v1061_v32, %v1400_v4 }
  0xd5   :  { %v734_v37 = vmin.f32 %v670_v29, 6.0  ;;  %v766_v38 = vmin.f32 %v702_v30, 6.0  ;;  %v368_v39 = vpop.f32.mrf.mxu0  ;;  %v528_v40 = vpop.f32.mrf.mxu1 }
  0xd6   :  { %v733_v41 = vmin.f32 %v669_v33, 6.0  ;;  %v765_v42 = vmin.f32 %v701_v34, 6.0  ;;  %v672_v43 = vmax.f32 %v374_v35, 0.0  ;;  %v704_v44 = vmax.f32 %v534_v36, 0.0 }
  0xd7   :  { %799 = vst.msk [vmem:[%s1725_s3 + $0x18] sm:$0xff] %vm795_vm1, %v734_v37  ;;  %831 = vst.msk [vmem:[%s1725_s3 + $0x118] sm:$0xff] %vm795_vm1, %v766_v38  ;;  %v369_v45 = vadd.f32 %v1400_v4, %v368_v39  ;;  %v529_v46 = vadd.f32 %v1400_v4, %v528_v40  ;;  %v1016_v47 = vpop.f32.mrf.mxu0  ;;  %v1064_v48 = vpop.f32.mrf.mxu1 }
  0xd8   :  { %798 = vst.msk [vmem:[%s1725_s3 + $0x10] sm:$0xff] %vm795_vm1, %v733_v41  ;;  %830 = vst.msk [vmem:[%s1725_s3 + $0x110] sm:$0xff] %vm795_vm1, %v765_v42  ;;  %v736_v49 = vmin.f32 %v672_v43, 6.0  ;;  %v768_v50 = vmin.f32 %v704_v44, 6.0  ;;  %v384_v51 = vadd.f32 %v1016_v47, %v1400_v4  ;;  %v544_v52 = vadd.f32 %v1064_v48, %v1400_v4 }
  0xd9   :  { %v671_v53 = vmax.f32 %v369_v45, 0.0  ;;  %v703_v54 = vmax.f32 %v529_v46, 0.0  ;;  %v378_v55 = vpop.f32.mrf.mxu0  ;;  %v538_v56 = vpop.f32.mrf.mxu1 }
  0xda   :  { %801 = vst.msk [vmem:[%s1725_s3 + $0x28] sm:$0xff] %vm795_vm1, %v736_v49  ;;  %833 = vst.msk [vmem:[%s1725_s3 + $0x128] sm:$0xff] %vm795_vm1, %v768_v50  ;;  %v674_v57 = vmax.f32 %v384_v51, 0.0  ;;  %v706_v58 = vmax.f32 %v544_v52, 0.0  ;;  %v379_v59 = vadd.f32 %v1400_v4, %v378_v55  ;;  %v539_v60 = vadd.f32 %v1400_v4, %v538_v56 }
  0xdb   :  { %v735_v61 = vmin.f32 %v671_v53, 6.0  ;;  %v767_v62 = vmin.f32 %v703_v54, 6.0  ;;  %v1019_v63 = vpop.f32.mrf.mxu0  ;;  %v1067_v0 = vpop.f32.mrf.mxu1 }
  0xdc   :  { %v738_v1 = vmin.f32 %v674_v57, 6.0  ;;  %v770_v2 = vmin.f32 %v706_v58, 6.0  ;;  %v673_v3 = vmax.f32 %v379_v59, 0.0  ;;  %v705_v5 = vmax.f32 %v539_v60, 0.0 }
  0xdd   :  { %800 = vst.msk [vmem:[%s1725_s3 + $0x20] sm:$0xff] %vm795_vm1, %v735_v61  ;;  %832 = vst.msk [vmem:[%s1725_s3 + $0x120] sm:$0xff] %vm795_vm1, %v767_v62  ;;  %v394_v6 = vadd.f32 %v1019_v63, %v1400_v4  ;;  %v554_v7 = vadd.f32 %v1067_v0, %v1400_v4  ;;  %v388_v8 = vpop.f32.mrf.mxu0  ;;  %v548_v9 = vpop.f32.mrf.mxu1 }
  0xde   :  { %803 = vst.msk [vmem:[%s1725_s3 + $0x38] sm:$0xff] %vm795_vm1, %v738_v1  ;;  %835 = vst.msk [vmem:[%s1725_s3 + $0x138] sm:$0xff] %vm795_vm1, %v770_v2  ;;  %v737_v10 = vmin.f32 %v673_v3, 6.0  ;;  %v769_v11 = vmin.f32 %v705_v5, 6.0  ;;  %v389_v12 = vadd.f32 %v1400_v4, %v388_v8  ;;  %v549_v13 = vadd.f32 %v1400_v4, %v548_v9 }
  0xdf   :  { %v676_v14 = vmax.f32 %v394_v6, 0.0  ;;  %v708_v15 = vmax.f32 %v554_v7, 0.0  ;;  %v1022_v16 = vpop.f32.mrf.mxu0  ;;  %v1070_v17 = vpop.f32.mrf.mxu1 }
  0xe0   :  { %802 = vst.msk [vmem:[%s1725_s3 + $0x30] sm:$0xff] %vm795_vm1, %v737_v10  ;;  %834 = vst.msk [vmem:[%s1725_s3 + $0x130] sm:$0xff] %vm795_vm1, %v769_v11  ;;  %v675_v18 = vmax.f32 %v389_v12, 0.0  ;;  %v707_v19 = vmax.f32 %v549_v13, 0.0  ;;  %v404_v20 = vadd.f32 %v1022_v16, %v1400_v4  ;;  %v564_v21 = vadd.f32 %v1070_v17, %v1400_v4 }
  0xe1   :  { %v740_v22 = vmin.f32 %v676_v14, 6.0  ;;  %v772_v23 = vmin.f32 %v708_v15, 6.0  ;;  %v398_v24 = vpop.f32.mrf.mxu0  ;;  %v558_v25 = vpop.f32.mrf.mxu1 }
  0xe2   :  { %v739_v26 = vmin.f32 %v675_v18, 6.0  ;;  %v771_v27 = vmin.f32 %v707_v19, 6.0  ;;  %v678_v28 = vmax.f32 %v404_v20, 0.0  ;;  %v710_v29 = vmax.f32 %v564_v21, 0.0 }
  0xe3   :  { %805 = vst.msk [vmem:[%s1725_s3 + $0x48] sm:$0xff] %vm795_vm1, %v740_v22  ;;  %837 = vst.msk [vmem:[%s1725_s3 + $0x148] sm:$0xff] %vm795_vm1, %v772_v23  ;;  %v399_v30 = vadd.f32 %v1400_v4, %v398_v24  ;;  %v559_v31 = vadd.f32 %v1400_v4, %v558_v25  ;;  %v1025_v32 = vpop.f32.mrf.mxu0  ;;  %v1073_v33 = vpop.f32.mrf.mxu1 }
  0xe4   :  { %804 = vst.msk [vmem:[%s1725_s3 + $0x40] sm:$0xff] %vm795_vm1, %v739_v26  ;;  %836 = vst.msk [vmem:[%s1725_s3 + $0x140] sm:$0xff] %vm795_vm1, %v771_v27  ;;  %v742_v34 = vmin.f32 %v678_v28, 6.0  ;;  %v774_v35 = vmin.f32 %v710_v29, 6.0  ;;  %v414_v36 = vadd.f32 %v1025_v32, %v1400_v4  ;;  %v574_v37 = vadd.f32 %v1073_v33, %v1400_v4 }
  0xe5   :  { %v677_v38 = vmax.f32 %v399_v30, 0.0  ;;  %v709_v39 = vmax.f32 %v559_v31, 0.0  ;;  %v408_v40 = vpop.f32.mrf.mxu0  ;;  %v568_v41 = vpop.f32.mrf.mxu1 }
  0xe6   :  { %807 = vst.msk [vmem:[%s1725_s3 + $0x58] sm:$0xff] %vm795_vm1, %v742_v34  ;;  %839 = vst.msk [vmem:[%s1725_s3 + $0x158] sm:$0xff] %vm795_vm1, %v774_v35  ;;  %v680_v42 = vmax.f32 %v414_v36, 0.0  ;;  %v712_v43 = vmax.f32 %v574_v37, 0.0  ;;  %v409_v44 = vadd.f32 %v1400_v4, %v408_v40  ;;  %v569_v45 = vadd.f32 %v1400_v4, %v568_v41 }
  0xe7   :  { %v741_v46 = vmin.f32 %v677_v38, 6.0  ;;  %v773_v47 = vmin.f32 %v709_v39, 6.0  ;;  %v1028_v48 = vpop.f32.mrf.mxu0  ;;  %v1076_v49 = vpop.f32.mrf.mxu1 }
  0xe8   :  { %v744_v50 = vmin.f32 %v680_v42, 6.0  ;;  %v776_v51 = vmin.f32 %v712_v43, 6.0  ;;  %v679_v52 = vmax.f32 %v409_v44, 0.0  ;;  %v711_v53 = vmax.f32 %v569_v45, 0.0 }
  0xe9   :  { %806 = vst.msk [vmem:[%s1725_s3 + $0x50] sm:$0xff] %vm795_vm1, %v741_v46  ;;  %838 = vst.msk [vmem:[%s1725_s3 + $0x150] sm:$0xff] %vm795_vm1, %v773_v47  ;;  %v424_v54 = vadd.f32 %v1028_v48, %v1400_v4  ;;  %v584_v55 = vadd.f32 %v1076_v49, %v1400_v4  ;;  %v418_v56 = vpop.f32.mrf.mxu0  ;;  %v578_v57 = vpop.f32.mrf.mxu1 }
  0xea   :  { %809 = vst.msk [vmem:[%s1725_s3 + $0x68] sm:$0xff] %vm795_vm1, %v744_v50  ;;  %841 = vst.msk [vmem:[%s1725_s3 + $0x168] sm:$0xff] %vm795_vm1, %v776_v51  ;;  %v743_v58 = vmin.f32 %v679_v52, 6.0  ;;  %v775_v59 = vmin.f32 %v711_v53, 6.0  ;;  %v419_v60 = vadd.f32 %v1400_v4, %v418_v56  ;;  %v579_v61 = vadd.f32 %v1400_v4, %v578_v57 }
  0xeb   :  { %v682_v62 = vmax.f32 %v424_v54, 0.0  ;;  %v714_v63 = vmax.f32 %v584_v55, 0.0  ;;  %v1031_v0 = vpop.f32.mrf.mxu0  ;;  %v1079_v1 = vpop.f32.mrf.mxu1 }
  0xec   :  { %808 = vst.msk [vmem:[%s1725_s3 + $0x60] sm:$0xff] %vm795_vm1, %v743_v58  ;;  %840 = vst.msk [vmem:[%s1725_s3 + $0x160] sm:$0xff] %vm795_vm1, %v775_v59  ;;  %v681_v2 = vmax.f32 %v419_v60, 0.0  ;;  %v713_v3 = vmax.f32 %v579_v61, 0.0  ;;  %v434_v5 = vadd.f32 %v1031_v0, %v1400_v4  ;;  %v594_v6 = vadd.f32 %v1079_v1, %v1400_v4 }
  0xed   :  { %v746_v7 = vmin.f32 %v682_v62, 6.0  ;;  %v778_v8 = vmin.f32 %v714_v63, 6.0  ;;  %v428_v9 = vpop.f32.mrf.mxu0  ;;  %v588_v10 = vpop.f32.mrf.mxu1 }
  0xee   :  { %v745_v11 = vmin.f32 %v681_v2, 6.0  ;;  %v777_v12 = vmin.f32 %v713_v3, 6.0  ;;  %v684_v13 = vmax.f32 %v434_v5, 0.0  ;;  %v716_v14 = vmax.f32 %v594_v6, 0.0 }
  0xef   :  { %811 = vst.msk [vmem:[%s1725_s3 + $0x78] sm:$0xff] %vm795_vm1, %v746_v7  ;;  %843 = vst.msk [vmem:[%s1725_s3 + $0x178] sm:$0xff] %vm795_vm1, %v778_v8  ;;  %v429_v15 = vadd.f32 %v1400_v4, %v428_v9  ;;  %v589_v16 = vadd.f32 %v1400_v4, %v588_v10  ;;  %v1034_v17 = vpop.f32.mrf.mxu0  ;;  %v1082_v18 = vpop.f32.mrf.mxu1 }
  0xf0   :  { %810 = vst.msk [vmem:[%s1725_s3 + $0x70] sm:$0xff] %vm795_vm1, %v745_v11  ;;  %842 = vst.msk [vmem:[%s1725_s3 + $0x170] sm:$0xff] %vm795_vm1, %v777_v12  ;;  %v748_v19 = vmin.f32 %v684_v13, 6.0  ;;  %v780_v20 = vmin.f32 %v716_v14, 6.0  ;;  %v444_v21 = vadd.f32 %v1034_v17, %v1400_v4  ;;  %v604_v22 = vadd.f32 %v1082_v18, %v1400_v4 }
  0xf1   :  { %v683_v23 = vmax.f32 %v429_v15, 0.0  ;;  %v715_v24 = vmax.f32 %v589_v16, 0.0  ;;  %v438_v25 = vpop.f32.mrf.mxu0  ;;  %v598_v26 = vpop.f32.mrf.mxu1 }
  0xf2   :  { %813 = vst.msk [vmem:[%s1725_s3 + $0x88] sm:$0xff] %vm795_vm1, %v748_v19  ;;  %845 = vst.msk [vmem:[%s1725_s3 + $0x188] sm:$0xff] %vm795_vm1, %v780_v20  ;;  %v686_v27 = vmax.f32 %v444_v21, 0.0  ;;  %v718_v28 = vmax.f32 %v604_v22, 0.0  ;;  %v439_v29 = vadd.f32 %v1400_v4, %v438_v25  ;;  %v599_v30 = vadd.f32 %v1400_v4, %v598_v26 }
  0xf3   :  { %v747_v31 = vmin.f32 %v683_v23, 6.0  ;;  %v779_v32 = vmin.f32 %v715_v24, 6.0  ;;  %v1037_v33 = vpop.f32.mrf.mxu0  ;;  %v1085_v34 = vpop.f32.mrf.mxu1 }
  0xf4   :  { %v750_v35 = vmin.f32 %v686_v27, 6.0  ;;  %v782_v36 = vmin.f32 %v718_v28, 6.0  ;;  %v685_v37 = vmax.f32 %v439_v29, 0.0  ;;  %v717_v38 = vmax.f32 %v599_v30, 0.0 }
  0xf5   :  { %812 = vst.msk [vmem:[%s1725_s3 + $0x80] sm:$0xff] %vm795_vm1, %v747_v31  ;;  %844 = vst.msk [vmem:[%s1725_s3 + $0x180] sm:$0xff] %vm795_vm1, %v779_v32  ;;  %v454_v39 = vadd.f32 %v1037_v33, %v1400_v4  ;;  %v614_v40 = vadd.f32 %v1085_v34, %v1400_v4  ;;  %v448_v41 = vpop.f32.mrf.mxu0  ;;  %v608_v42 = vpop.f32.mrf.mxu1 }
  0xf6   :  { %815 = vst.msk [vmem:[%s1725_s3 + $0x98] sm:$0xff] %vm795_vm1, %v750_v35  ;;  %847 = vst.msk [vmem:[%s1725_s3 + $0x198] sm:$0xff] %vm795_vm1, %v782_v36  ;;  %v749_v43 = vmin.f32 %v685_v37, 6.0  ;;  %v781_v44 = vmin.f32 %v717_v38, 6.0  ;;  %v449_v45 = vadd.f32 %v1400_v4, %v448_v41  ;;  %v609_v46 = vadd.f32 %v1400_v4, %v608_v42 }
  0xf7   :  { %v688_v47 = vmax.f32 %v454_v39, 0.0  ;;  %v720_v48 = vmax.f32 %v614_v40, 0.0  ;;  %v1040_v49 = vpop.f32.mrf.mxu0  ;;  %v1088_v50 = vpop.f32.mrf.mxu1 }
  0xf8   :  { %814 = vst.msk [vmem:[%s1725_s3 + $0x90] sm:$0xff] %vm795_vm1, %v749_v43  ;;  %846 = vst.msk [vmem:[%s1725_s3 + $0x190] sm:$0xff] %vm795_vm1, %v781_v44  ;;  %v687_v51 = vmax.f32 %v449_v45, 0.0  ;;  %v719_v52 = vmax.f32 %v609_v46, 0.0  ;;  %v464_v53 = vadd.f32 %v1040_v49, %v1400_v4  ;;  %v624_v54 = vadd.f32 %v1088_v50, %v1400_v4 }
  0xf9   :  { %v752_v55 = vmin.f32 %v688_v47, 6.0  ;;  %v784_v56 = vmin.f32 %v720_v48, 6.0  ;;  %v458_v57 = vpop.f32.mrf.mxu0  ;;  %v618_v58 = vpop.f32.mrf.mxu1 }
  0xfa   :  { %v751_v59 = vmin.f32 %v687_v51, 6.0  ;;  %v783_v60 = vmin.f32 %v719_v52, 6.0  ;;  %v690_v61 = vmax.f32 %v464_v53, 0.0  ;;  %v722_v62 = vmax.f32 %v624_v54, 0.0 }
  0xfb   :  { %817 = vst.msk [vmem:[%s1725_s3 + $0xa8] sm:$0xff] %vm795_vm1, %v752_v55  ;;  %849 = vst.msk [vmem:[%s1725_s3 + $0x1a8] sm:$0xff] %vm795_vm1, %v784_v56  ;;  %v459_v63 = vadd.f32 %v1400_v4, %v458_v57  ;;  %v619_v0 = vadd.f32 %v1400_v4, %v618_v58  ;;  %v1043_v1 = vpop.f32.mrf.mxu0  ;;  %v1091_v2 = vpop.f32.mrf.mxu1 }
  0xfc   :  { %816 = vst.msk [vmem:[%s1725_s3 + $0xa0] sm:$0xff] %vm795_vm1, %v751_v59  ;;  %848 = vst.msk [vmem:[%s1725_s3 + $0x1a0] sm:$0xff] %vm795_vm1, %v783_v60  ;;  %v754_v3 = vmin.f32 %v690_v61, 6.0  ;;  %v786_v5 = vmin.f32 %v722_v62, 6.0  ;;  %v474_v6 = vadd.f32 %v1043_v1, %v1400_v4  ;;  %v634_v7 = vadd.f32 %v1091_v2, %v1400_v4 }
  0xfd   :  { %v689_v8 = vmax.f32 %v459_v63, 0.0  ;;  %v721_v9 = vmax.f32 %v619_v0, 0.0  ;;  %v468_v10 = vpop.f32.mrf.mxu0  ;;  %v628_v11 = vpop.f32.mrf.mxu1 }
  0xfe   :  { %819 = vst.msk [vmem:[%s1725_s3 + $0xb8] sm:$0xff] %vm795_vm1, %v754_v3  ;;  %851 = vst.msk [vmem:[%s1725_s3 + $0x1b8] sm:$0xff] %vm795_vm1, %v786_v5  ;;  %v692_v12 = vmax.f32 %v474_v6, 0.0  ;;  %v724_v13 = vmax.f32 %v634_v7, 0.0  ;;  %v469_v14 = vadd.f32 %v1400_v4, %v468_v10  ;;  %v629_v15 = vadd.f32 %v1400_v4, %v628_v11 }
  0xff   :  { %v753_v16 = vmin.f32 %v689_v8, 6.0  ;;  %v785_v17 = vmin.f32 %v721_v9, 6.0  ;;  %v1046_v18 = vpop.f32.mrf.mxu0  ;;  %v1094_v19 = vpop.f32.mrf.mxu1 }
 0x100   :  { %v756_v20 = vmin.f32 %v692_v12, 6.0  ;;  %v788_v21 = vmin.f32 %v724_v13, 6.0  ;;  %v691_v22 = vmax.f32 %v469_v14, 0.0  ;;  %v723_v23 = vmax.f32 %v629_v15, 0.0 }
 0x101   :  { %818 = vst.msk [vmem:[%s1725_s3 + $0xb0] sm:$0xff] %vm795_vm1, %v753_v16  ;;  %850 = vst.msk [vmem:[%s1725_s3 + $0x1b0] sm:$0xff] %vm795_vm1, %v785_v17  ;;  %v484_v24 = vadd.f32 %v1046_v18, %v1400_v4  ;;  %v644_v25 = vadd.f32 %v1094_v19, %v1400_v4  ;;  %v478_v26 = vpop.f32.mrf.mxu0  ;;  %v638_v27 = vpop.f32.mrf.mxu1 }
 0x102   :  { %821 = vst.msk [vmem:[%s1725_s3 + $0xc8] sm:$0xff] %vm795_vm1, %v756_v20  ;;  %853 = vst.msk [vmem:[%s1725_s3 + $0x1c8] sm:$0xff] %vm795_vm1, %v788_v21  ;;  %v755_v28 = vmin.f32 %v691_v22, 6.0  ;;  %v787_v29 = vmin.f32 %v723_v23, 6.0  ;;  %v479_v30 = vadd.f32 %v1400_v4, %v478_v26  ;;  %v639_v31 = vadd.f32 %v1400_v4, %v638_v27 }
 0x103   :  { %v694_v32 = vmax.f32 %v484_v24, 0.0  ;;  %v726_v33 = vmax.f32 %v644_v25, 0.0  ;;  %v1049_v34 = vpop.f32.mrf.mxu0  ;;  %v1097_v35 = vpop.f32.mrf.mxu1 }
 0x104   :  { %820 = vst.msk [vmem:[%s1725_s3 + $0xc0] sm:$0xff] %vm795_vm1, %v755_v28  ;;  %852 = vst.msk [vmem:[%s1725_s3 + $0x1c0] sm:$0xff] %vm795_vm1, %v787_v29  ;;  %v693_v36 = vmax.f32 %v479_v30, 0.0  ;;  %v725_v37 = vmax.f32 %v639_v31, 0.0  ;;  %v494_v38 = vadd.f32 %v1049_v34, %v1400_v4  ;;  %v654_v39 = vadd.f32 %v1097_v35, %v1400_v4 }
 0x105   :  { %v758_v40 = vmin.f32 %v694_v32, 6.0  ;;  %v790_v41 = vmin.f32 %v726_v33, 6.0  ;;  %v488_v42 = vpop.f32.mrf.mxu0  ;;  %v648_v43 = vpop.f32.mrf.mxu1 }
 0x106   :  { %v757_v44 = vmin.f32 %v693_v36, 6.0  ;;  %v789_v45 = vmin.f32 %v725_v37, 6.0  ;;  %v696_v46 = vmax.f32 %v494_v38, 0.0  ;;  %v728_v47 = vmax.f32 %v654_v39, 0.0 }
 0x107   :  { %823 = vst.msk [vmem:[%s1725_s3 + $0xd8] sm:$0xff] %vm795_vm1, %v758_v40  ;;  %855 = vst.msk [vmem:[%s1725_s3 + $0x1d8] sm:$0xff] %vm795_vm1, %v790_v41  ;;  %v489_v48 = vadd.f32 %v1400_v4, %v488_v42  ;;  %v649_v49 = vadd.f32 %v1400_v4, %v648_v43  ;;  %v1052_v50 = vpop.f32.mrf.mxu0  ;;  %v1100_v51 = vpop.f32.mrf.mxu1 }
 0x108   :  { %822 = vst.msk [vmem:[%s1725_s3 + $0xd0] sm:$0xff] %vm795_vm1, %v757_v44  ;;  %854 = vst.msk [vmem:[%s1725_s3 + $0x1d0] sm:$0xff] %vm795_vm1, %v789_v45  ;;  %v760_v52 = vmin.f32 %v696_v46, 6.0  ;;  %v792_v53 = vmin.f32 %v728_v47, 6.0  ;;  %v504_v54 = vadd.f32 %v1052_v50, %v1400_v4  ;;  %v664_v55 = vadd.f32 %v1100_v51, %v1400_v4 }
 0x109   :  { %v695_v56 = vmax.f32 %v489_v48, 0.0  ;;  %v727_v57 = vmax.f32 %v649_v49, 0.0  ;;  %v498_v58 = vpop.f32.mrf.mxu0  ;;  %v658_v59 = vpop.f32.mrf.mxu1 }
 0x10a   :  { %825 = vst.msk [vmem:[%s1725_s3 + $0xe8] sm:$0xff] %vm795_vm1, %v760_v52  ;;  %857 = vst.msk [vmem:[%s1725_s3 + $0x1e8] sm:$0xff] %vm795_vm1, %v792_v53  ;;  %v698_v60 = vmax.f32 %v504_v54, 0.0  ;;  %v730_v61 = vmax.f32 %v664_v55, 0.0  ;;  %v499_v62 = vadd.f32 %v1400_v4, %v498_v58  ;;  %v659_v63 = vadd.f32 %v1400_v4, %v658_v59 }
 0x10b   :  { %v759_v0 = vmin.f32 %v695_v56, 6.0  ;;  %v791_v1 = vmin.f32 %v727_v57, 6.0 }
 0x10c   :  { %v762_v2 = vmin.f32 %v698_v60, 6.0  ;;  %v794_v3 = vmin.f32 %v730_v61, 6.0  ;;  %v697_v5 = vmax.f32 %v499_v62, 0.0  ;;  %v729_v6 = vmax.f32 %v659_v63, 0.0 }
 0x10d   :  { %824 = vst.msk [vmem:[%s1725_s3 + $0xe0] sm:$0xff] %vm795_vm1, %v759_v0  ;;  %856 = vst.msk [vmem:[%s1725_s3 + $0x1e0] sm:$0xff] %vm795_vm1, %v791_v1 }
 0x10e   :  { %827 = vst.msk [vmem:[%s1725_s3 + $0xf8] sm:$0xff] %vm795_vm1, %v762_v2  ;;  %859 = vst.msk [vmem:[%s1725_s3 + $0x1f8] sm:$0xff] %vm795_vm1, %v794_v3  ;;  %v761_v4 = vmin.f32 %v697_v5, 6.0  ;;  %v793_v7 = vmin.f32 %v729_v6, 6.0 }
 0x110   :  { %826 = vst.msk [vmem:[%s1725_s3 + $0xf0] sm:$0xff] %vm795_vm1, %v761_v4  ;;  %858 = vst.msk [vmem:[%s1725_s3 + $0x1f0] sm:$0xff] %vm795_vm1, %v793_v7 }

</bundles_post_ra>
